<compile_context>
chip_gen: v7x
topology: tpu7x:2x2x1
jax: 0.10.0
libtpu: 0.0.40
codegen_flags: <defaults>
</compile_context>

<pallas_src>
import functools
import math

import jax
import jax.numpy as jnp
from jax.experimental import pallas as pl
from jax.experimental.pallas import tpu as pltpu


def _popart_affine_kernel(x_ref, w_ref, b_ref, o_ref):
    """out = eff_w * x + eff_b ; params are (1, LANE) rows broadcast over sublanes."""
    x = x_ref[...].astype(jnp.float32)                       # (TR, LANE)
    o_ref[...] = (w_ref[...] * x + b_ref[...]).astype(o_ref.dtype)


def _round_up(n, m):
    return ((n + m - 1) // m) * m


@functools.partial(jax.jit, static_argnames=("normalized", "enabled", "tile_rows"))
def popart_forward(x, w, b, mu, nu, normalized=True, enabled=True, tile_rows=None):
    """x: (B, L, G, 1); w/b/mu/nu: (G, 1).  Returns same shape/dtype as x."""
    if not enabled:
        return x

    B, L, G, one = x.shape
    assert one == 1
    total = B * L * G

    # ---- fold sigma/mu into a single per-gamma affine (tiny, done in JAX) ----
    w1 = w.reshape(G).astype(jnp.float32)
    b1 = b.reshape(G).astype(jnp.float32)
    if normalized:
        eff_w, eff_b = w1, b1
    else:
        mu1 = mu.reshape(G).astype(jnp.float32)
        nu1 = nu.reshape(G).astype(jnp.float32)
        inner = jnp.clip(nu1 - mu1 * mu1, 1e-4, 1e8)
        sigma = jnp.clip(jnp.sqrt(inner), 1e-4, 1e6)
        eff_w = sigma * w1
        eff_b = sigma * b1 + mu1

    # ---- lane-dense layout: flatten so gamma cycles along the lane axis ----
    # flat index = (b*L + l)*G + g, so an element's gamma = flat_index % G.
    # LANE is a multiple of both 128 and G, so lane c always maps to gamma c % G.
    LANE = math.lcm(128, G)
    # TODO(synk): for pathological G with large prime factors LANE grows large;
    # fall back to a (rows, G)-blocked layout with masked stores if that ever matters.

    # Pad only to a multiple of 8*LANE (one (8,128) tile-row group); the grid
    # handles any remaining non-divisibility with a partial last block.
    padded_total = _round_up(total, 8 * LANE)
    n_rows = padded_total // LANE

    # Row tile: target ~2 MiB of f32 per input block, multiple of 8 sublanes.
    if tile_rows is None:
        TR = max(8, ((2 * 1024 * 1024) // (LANE * 4)) // 8 * 8)
    else:
        TR = _round_up(int(tile_rows), 8)
    TR = min(TR, n_rows)

    x_flat = x.reshape(total)
    if padded_total != total:
        x_flat = jnp.pad(x_flat, (0, padded_total - total))
    x2 = x_flat.reshape(n_rows, LANE)

    reps = LANE // G
    w2 = jnp.tile(eff_w, reps).reshape(1, LANE)
    b2 = jnp.tile(eff_b, reps).reshape(1, LANE)

    grid = (pl.cdiv(n_rows, TR),)
    row_spec = pl.BlockSpec((TR, LANE), lambda i: (i, 0))
    par_spec = pl.BlockSpec((1, LANE), lambda i: (0, 0))

    out2 = pl.pallas_call(
        _popart_affine_kernel,
        out_shape=jax.ShapeDtypeStruct((n_rows, LANE), x.dtype),
        grid_spec=pltpu.PrefetchScalarGridSpec(
            num_scalar_prefetch=0,
            grid=grid,
            in_specs=[row_spec, par_spec, par_spec],
            out_specs=row_spec,
        ),
        compiler_params=pltpu.CompilerParams(
            dimension_semantics=("parallel",),
        ),
    )(x2, w2, b2)

    out_flat = out2.reshape(padded_total)[:total]
    return out_flat.reshape(B, L, G, 1)


def popart_reference(x, w, b, mu, nu, normalized=True):
    """Pure-JAX reference mirroring the PyTorch forward."""
    normed = w * x + b
    if normalized:
        return normed.astype(x.dtype)
    inner = jnp.clip(nu - mu * mu, 1e-4, 1e8)
    sigma = jnp.clip(jnp.sqrt(inner), 1e-4, 1e6)
    return (sigma * normed + mu).astype(x.dtype)


if __name__ == "__main__":
    key = jax.random.PRNGKey(0)

    B, L, G = 2, 8, 4
    init_nu = 100.0

    kx, kmu, kw, kb, kx2 = jax.random.split(key, 5)
    x = jax.random.normal(kx, (B, L, G, 1), dtype=jnp.float32)

    # Buffers per __init__ (mu=0, nu=init_nu, w=1, b=0), perturbed so the math
    # is non-trivial but deterministic.
    mu = jnp.zeros((G, 1), jnp.float32) + 0.1 * jax.random.normal(kmu, (G, 1))
    nu = jnp.ones((G, 1), jnp.float32) * init_nu
    w = jnp.ones((G, 1), jnp.float32) + 0.05 * jax.random.normal(kw, (G, 1))
    b = jnp.zeros((G, 1), jnp.float32) + 0.05 * jax.random.normal(kb, (G, 1))

    # normalized branch
    out_norm = popart_forward(x, w, b, mu, nu, normalized=True)
    out_norm = jax.block_until_ready(out_norm)
    ref_norm = popart_reference(x, w, b, mu, nu, normalized=True)

    # de-normalized branch
    out_den = popart_forward(x, w, b, mu, nu, normalized=False)
    out_den = jax.block_until_ready(out_den)
    ref_den = popart_reference(x, w, b, mu, nu, normalized=False)

    assert out_norm.shape == x.shape and out_norm.dtype == x.dtype
    assert out_den.shape == x.shape and out_den.dtype == x.dtype
    assert jnp.allclose(out_norm, ref_norm, atol=1e-5, rtol=1e-5)
    assert jnp.allclose(out_den, ref_den, atol=1e-5, rtol=1e-5)

    # Extra check: multi-block grid with a partial last block (small tile_rows
    # forced so the pl.cdiv / partial-block path is exercised at a small size).
    B2, L2 = 2, 1000
    x_big = jax.random.normal(kx2, (B2, L2, G, 1), dtype=jnp.float32)
    out_big = popart_forward(x_big, w, b, mu, nu, normalized=False, tile_rows=24)
    out_big = jax.block_until_ready(out_big)
    ref_big = popart_reference(x_big, w, b, mu, nu, normalized=False)
    assert jnp.allclose(out_big, ref_big, atol=1e-5, rtol=1e-5)

    # TODO(synk): update_stats / normalize_values are stateful training-time
    # utilities (not part of forward) and are left out of the kernel.
    print("KERNEL_OK")
</pallas_src>

<mosaic_0001>
module attributes {stable_mosaic.version = 11 : i64} {
  func.func @_popart_affine_kernel(%arg0: i32, %arg1: memref<8x128xf32, #tpu.memory_space<vmem>>, %arg2: memref<1x128xf32, #tpu.memory_space<vmem>>, %arg3: memref<1x128xf32, #tpu.memory_space<vmem>>, %arg4: memref<8x128xf32, #tpu.memory_space<vmem>>) attributes {dimension_semantics = [#tpu.dimension_semantics<parallel>], iteration_bounds = array<i64: 1>, scalar_prefetch = 0 : i64, scratch_operands = 0 : i64, tpu.core_type = #tpu.core_type<tc>, window_params = [{transform_indices = @transform_0, window_bounds = array<i64: 8, 128>}, {pipeline_mode = #tpu.pipeline_mode<synchronous>, transform_indices = @transform_1, window_bounds = array<i64: 1, 128>}, {pipeline_mode = #tpu.pipeline_mode<synchronous>, transform_indices = @transform_2, window_bounds = array<i64: 1, 128>}, {transform_indices = @transform_3, window_bounds = array<i64: 8, 128>}]} {
    %c0 = arith.constant 0 : index
    %c0_0 = arith.constant 0 : index
    %0 = vector.load %arg1[%c0, %c0_0] : memref<8x128xf32, #tpu.memory_space<vmem>>, vector<8x128xf32>
    %c0_1 = arith.constant 0 : index
    %c0_2 = arith.constant 0 : index
    %1 = vector.load %arg2[%c0_1, %c0_2] : memref<1x128xf32, #tpu.memory_space<vmem>>, vector<1x128xf32>
    %2 = vector.broadcast %1 : vector<1x128xf32> to vector<8x128xf32>
    %3 = arith.mulf %2, %0 : vector<8x128xf32>
    %c0_3 = arith.constant 0 : index
    %c0_4 = arith.constant 0 : index
    %4 = vector.load %arg3[%c0_3, %c0_4] : memref<1x128xf32, #tpu.memory_space<vmem>>, vector<1x128xf32>
    %5 = vector.broadcast %4 : vector<1x128xf32> to vector<8x128xf32>
    %6 = arith.addf %3, %5 : vector<8x128xf32>
    %c0_5 = arith.constant 0 : index
    %c0_6 = arith.constant 0 : index
    %7 = vector.load %arg4[%c0_5, %c0_6] : memref<8x128xf32, #tpu.memory_space<vmem>>, vector<8x128xf32>
    tpu.vector_store %arg4[%c0_5, %c0_6], %6 {strides = array<i32>} : memref<8x128xf32, #tpu.memory_space<vmem>>, vector<8x128xf32>,
    return
  }
  func.func @transform_0(%arg0: i32) -> (i32, i32) {
    %c0_i32 = arith.constant 0 : i32
    %c0_i32_0 = arith.constant 0 : i32
    return %arg0, %c0_i32 : i32, i32
  }
  func.func @transform_1(%arg0: i32) -> (i32, i32) {
    %c0_i32 = arith.constant 0 : i32
    %c0_i32_0 = arith.constant 0 : i32
    %c0_i32_1 = arith.constant 0 : i32
    return %c0_i32, %c0_i32_0 : i32, i32
  }
  func.func @transform_2(%arg0: i32) -> (i32, i32) {
    %c0_i32 = arith.constant 0 : i32
    %c0_i32_0 = arith.constant 0 : i32
    %c0_i32_1 = arith.constant 0 : i32
    return %c0_i32, %c0_i32_0 : i32, i32
  }
  func.func @transform_3(%arg0: i32) -> (i32, i32) {
    %c0_i32 = arith.constant 0 : i32
    %c0_i32_0 = arith.constant 0 : i32
    return %arg0, %c0_i32 : i32, i32
  }
}

</mosaic_0001>

<bundles_post_ra>
// kernel: tile.10
= control target key start
LH: loop header
LB: loop body
LE: loop exit
PB: predicated region body
PF: predicated region fallthrough
CT: control target
= control target key end

     0   :  { %s40_s0 = inlined_call_operand.vmem [shape: f32[4], index: 0, kind: input, shape index: {}]   ;;  %s41_s1 = inlined_call_operand.vmem [shape: f32[32,4], index: 1, kind: output, shape index: {}]  }
   0x1   :  { %v4_v0 = vld [vmem:[%s40_s0] ss:$0 sm:$0xff] }
   0x2   :  { %5 = vst [vmem:[%s41_s1] sm:$0xff] %v4_v0  ;;  %12 = vst [vmem:[%s41_s1 + $0x8] sm:$0xff] %v4_v0 }
   0x3   :  { %13 = vst [vmem:[%s41_s1 + $0x10] sm:$0xff] %v4_v0  ;;  %14 = vst [vmem:[%s41_s1 + $0x18] sm:$0xff] %v4_v0 }

// kernel: tile.11
= control target key start
LH: loop header
LB: loop body
LE: loop exit
PB: predicated region body
PF: predicated region fallthrough
CT: control target
= control target key end

     0   :  { %s259_s10 = smov 124   ;;  %s260_s11 = smov 116   ;;  %vm3_vm0 = vcmask 31744   ;;  %vm9_vm1 = vcmask 1048544   ;;  %vm15_vm2 = vcmask 1015744   ;;  %vm21_vm3 = vcmask 982944   ;;  %s399_s0 = inlined_call_operand.vmem [shape: f32[32,4], index: 0, kind: input, shape index: {}]   ;;  %s400_s1 = inlined_call_operand.vmem [shape: f32[1,128], index: 1, kind: output, shape index: {}]  }
   0x1   :  { %v197_v0 = vld [vmem:[%s399_s0 + $0x1f] sm:$0x1]   ;;  %v199_v1 = vld [vmem:[%s399_s0 + $0x1d] sm:$0x1]   ;;  %v198_v2 = vld [vmem:[%s399_s0 + $0x1e] sm:$0x1]  }
   0x2   :  { %7 = vrot.lane.b32.xlu0 %v197_v0, %s259_s10  ;;  %19 = vrot.lane.b32.xlu1 %v199_v1, %s260_s11  ;;  %v200_v3 = vld [vmem:[%s399_s0 + $0x1c] sm:$0x1]   ;;  %s261_s16 = smov 120   ;;  %s262_s17 = smov 112   ;;  %v201_v4 = vld [vmem:[%s399_s0 + $0x1b] sm:$0x1]  }
   0x3   :  { %v202_v5 = vld [vmem:[%s399_s0 + $0x1a] sm:$0x1]   ;;  %s263_s22 = smov 108   ;;  %s264_s23 = smov 104   ;;  %v203_v6 = vld [vmem:[%s399_s0 + $0x19] sm:$0x1]  }
   0x4   :  { %v204_v7 = vld [vmem:[%s399_s0 + $0x18] sm:$0x1]   ;;  %s265_s28 = smov 100   ;;  %s266_s29 = smov 96   ;;  %v205_v8 = vld [vmem:[%s399_s0 + $0x17] sm:$0x1]  }
   0x5   :  { %v206_v9 = vld [vmem:[%s399_s0 + $0x16] sm:$0x1]   ;;  %v2_v10 = vld [vmem:[%s399_s0] sm:$0x1]   ;;  %s267_s7 = smov 92   ;;  %s268_s8 = smov 88  }
   0x6   :  { %13 = vrot.lane.b32.xlu0 %v198_v2, %s261_s16  ;;  %25 = vrot.lane.b32.xlu1 %v200_v3, %s262_s17  ;;  %4 = vst.msk [vmem:[#allocation0] sm:$0x1] %vm3_vm0, %v2_v10   ;;  %v207_v11 = vld [vmem:[%s399_s0 + $0x15] sm:$0x1]   ;;  %v208_v12 = vld [vmem:[%s399_s0 + $0x14] sm:$0x1]  }
   0x7   :  { %s269_s13 = smov 84   ;;  %s270_s14 = smov 80   ;;  %v209_v13 = vld [vmem:[%s399_s0 + $0x13] sm:$0x1]   ;;  %v210_v14 = vld [vmem:[%s399_s0 + $0x12] sm:$0x1]  }
   0x8   :  { %s271_s19 = smov 76   ;;  %s272_s20 = smov 72   ;;  %v211_v15 = vld [vmem:[%s399_s0 + $0x11] sm:$0x1]   ;;  %v212_v16 = vld [vmem:[%s399_s0 + $0x10] sm:$0x1]  }
   0x9   :  { %s273_s25 = smov 68   ;;  %s274_s26 = smov 64   ;;  %v213_v17 = vld [vmem:[%s399_s0 + $0xf] sm:$0x1]   ;;  %v214_v18 = vld [vmem:[%s399_s0 + $0xe] sm:$0x1]  }
   0xa   :  { %31 = vrot.lane.b32.xlu0 %v201_v4, %s263_s22  ;;  %37 = vrot.lane.b32.xlu1 %v202_v5, %s264_s23  ;;  %s275_s2 = smov 60   ;;  %s276_s3 = smov 56   ;;  %v215_v19 = vld [vmem:[%s399_s0 + $0xd] sm:$0x1]   ;;  %v216_v20 = vld [vmem:[%s399_s0 + $0xc] sm:$0x1]  }
   0xb   :  { %s278_s9 = smov 48   ;;  %v217_v21 = vld [vmem:[%s399_s0 + $0xb] sm:$0x1]   ;;  %v218_v22 = vld [vmem:[%s399_s0 + $0xa] sm:$0x1]   ;;  %s280_s15 = smov 40  }
   0xc   :  { %v219_v23 = vld [vmem:[%s399_s0 + $0x9] sm:$0x1]   ;;  %v220_v24 = vld [vmem:[%s399_s0 + $0x8] sm:$0x1]   ;;  %s282_s21 = smov 32   ;;  %s284_s27 = smov 24  }
   0xd   :  { %v221_v25 = vld [vmem:[%s399_s0 + $0x7] sm:$0x1]   ;;  %v222_v26 = vld [vmem:[%s399_s0 + $0x6] sm:$0x1]   ;;  %v223_v27 = vld [vmem:[%s399_s0 + $0x5] sm:$0x1]  }
   0xe   :  { %43 = vrot.lane.b32.xlu0 %v203_v6, %s265_s28  ;;  %49 = vrot.lane.b32.xlu1 %v204_v7, %s266_s29  ;;  %v224_v28 = vld [vmem:[%s399_s0 + $0x4] sm:$0x1]   ;;  %s286_s4 = smov 16   ;;  %v225_v29 = vld [vmem:[%s399_s0 + $0x3] sm:$0x1]   ;;  %s288_s10 = smov 8  }
   0xf   :  { %v226_v30 = vld [vmem:[%s399_s0 + $0x2] sm:$0x1]   ;;  %v227_v31 = vld [vmem:[%s399_s0 + $0x1] sm:$0x1]   ;;  %s289_s0 = smov 4   ;;  %vm27_vm4 = vcmask 950144  }
  0x10   :  { %vm33_vm5 = vcmask 917344   ;;  %vm39_vm6 = vcmask 884544   ;;  %vm45_vm7 = vcmask 851744   ;;  %vm51_vm8 = vcmask 818944  }
  0x11   :  { %vm57_vm9 = vcmask 786144   ;;  %vm63_vm10 = vcmask 753344   ;;  %vm69_vm11 = vcmask 720544   ;;  %vm75_vm12 = vcmask 687744  }
  0x12   :  { %55 = vrot.lane.b32.xlu0 %v205_v8, %s267_s7  ;;  %61 = vrot.lane.b32.xlu1 %v206_v9, %s268_s8  ;;  %s277_s8 = smov 52   ;;  %vm81_vm13 = vcmask 654944   ;;  %vm87_vm14 = vcmask 622144   ;;  %vm93_vm15 = vcmask 589344   ;;  %vm99_vm0 = vcmask 556544  }
  0x16   :  { %67 = vrot.lane.b32.xlu0 %v207_v11, %s269_s13  ;;  %73 = vrot.lane.b32.xlu1 %v208_v12, %s270_s14  ;;  %s279_s14 = smov 44  }
  0x1a   :  { %79 = vrot.lane.b32.xlu0 %v209_v13, %s271_s19  ;;  %85 = vrot.lane.b32.xlu1 %v210_v14, %s272_s20  ;;  %s281_s20 = smov 36  }
  0x1e   :  { %91 = vrot.lane.b32.xlu0 %v211_v15, %s273_s25  ;;  %97 = vrot.lane.b32.xlu1 %v212_v16, %s274_s26  ;;  %s283_s26 = smov 28  }
  0x22   :  { %103 = vrot.lane.b32.xlu0 %v213_v17, %s275_s2  ;;  %109 = vrot.lane.b32.xlu1 %v214_v18, %s276_s3  ;;  %s285_s3 = smov 20  }
  0x26   :  { %115 = vrot.lane.b32.xlu0 %v215_v19, %s277_s8  ;;  %121 = vrot.lane.b32.xlu1 %v216_v20, %s278_s9  ;;  %s287_s9 = smov 12  }
  0x2a   :  { %127 = vrot.lane.b32.xlu0 %v217_v21, %s279_s14  ;;  %133 = vrot.lane.b32.xlu1 %v218_v22, %s280_s15 }
  0x2e   :  { %139 = vrot.lane.b32.xlu0 %v219_v23, %s281_s20  ;;  %145 = vrot.lane.b32.xlu1 %v220_v24, %s282_s21 }
  0x32   :  { %151 = vrot.lane.b32.xlu0 %v221_v25, %s283_s26  ;;  %157 = vrot.lane.b32.xlu1 %v222_v26, %s284_s27 }
  0x36   :  { %163 = vrot.lane.b32.xlu0 %v223_v27, %s285_s3  ;;  %169 = vrot.lane.b32.xlu1 %v224_v28, %s286_s4 }
  0x3a   :  { %175 = vrot.lane.b32.xlu0 %v225_v29, %s287_s9  ;;  %181 = vrot.lane.b32.xlu1 %v226_v30, %s288_s10 }
  0x3e   :  { %187 = vrot.lane.b32.xlu0 %v227_v31, %s289_s0 }
  0x74   :  { %v8_v32 = vpop.permute.xlu0 %7   ;;  %v20_v33 = vpop.permute.xlu1 %19  }
  0x75   :  { %10 = vst.msk [vmem:[#allocation0] sm:$0x1] %vm9_vm1, %v8_v32   ;;  %vm105_vm1 = vcmask 523744  }
  0x78   :  { %v14_v34 = vpop.permute.xlu0 %13   ;;  %v26_v35 = vpop.permute.xlu1 %25  }
  0x79   :  { %16 = vst.msk [vmem:[#allocation0] sm:$0x1] %vm15_vm2, %v14_v34   ;;  %vm111_vm2 = vcmask 490944  }
  0x7a   :  { %22 = vst.msk [vmem:[#allocation0] sm:$0x1] %vm21_vm3, %v20_v33   ;;  %vm117_vm3 = vcmask 458144  }
  0x7b   :  { %28 = vst.msk [vmem:[#allocation0] sm:$0x1] %vm27_vm4, %v26_v35   ;;  %vm123_vm4 = vcmask 425344  }
  0x7c   :  { %v32_v36 = vpop.permute.xlu0 %31   ;;  %v38_v37 = vpop.permute.xlu1 %37  }
  0x7d   :  { %34 = vst.msk [vmem:[#allocation0] sm:$0x1] %vm33_vm5, %v32_v36   ;;  %vm129_vm5 = vcmask 392544  }
  0x7e   :  { %40 = vst.msk [vmem:[#allocation0] sm:$0x1] %vm39_vm6, %v38_v37   ;;  %vm135_vm6 = vcmask 359744  }
  0x80   :  { %v44_v38 = vpop.permute.xlu0 %43   ;;  %v50_v39 = vpop.permute.xlu1 %49  }
  0x81   :  { %46 = vst.msk [vmem:[#allocation0] sm:$0x1] %vm45_vm7, %v44_v38   ;;  %vm141_vm7 = vcmask 326944  }
  0x82   :  { %52 = vst.msk [vmem:[#allocation0] sm:$0x1] %vm51_vm8, %v50_v39   ;;  %vm147_vm8 = vcmask 294144  }
  0x84   :  { %v56_v40 = vpop.permute.xlu0 %55   ;;  %v62_v41 = vpop.permute.xlu1 %61  }
  0x85   :  { %58 = vst.msk [vmem:[#allocation0] sm:$0x1] %vm57_vm9, %v56_v40   ;;  %vm153_vm9 = vcmask 261344  }
  0x86   :  { %64 = vst.msk [vmem:[#allocation0] sm:$0x1] %vm63_vm10, %v62_v41   ;;  %vm159_vm10 = vcmask 228544  }
  0x88   :  { %v68_v42 = vpop.permute.xlu0 %67   ;;  %v74_v43 = vpop.permute.xlu1 %73  }
  0x89   :  { %70 = vst.msk [vmem:[#allocation0] sm:$0x1] %vm69_vm11, %v68_v42   ;;  %vm165_vm11 = vcmask 195744  }
  0x8a   :  { %76 = vst.msk [vmem:[#allocation0] sm:$0x1] %vm75_vm12, %v74_v43   ;;  %vm171_vm12 = vcmask 162944  }
  0x8c   :  { %v80_v44 = vpop.permute.xlu0 %79   ;;  %v86_v45 = vpop.permute.xlu1 %85  }
  0x8d   :  { %82 = vst.msk [vmem:[#allocation0] sm:$0x1] %vm81_vm13, %v80_v44   ;;  %vm177_vm13 = vcmask 130144  }
  0x8e   :  { %88 = vst.msk [vmem:[#allocation0] sm:$0x1] %vm87_vm14, %v86_v45   ;;  %vm183_vm14 = vcmask 97344  }
  0x90   :  { %v92_v46 = vpop.permute.xlu0 %91   ;;  %v98_v47 = vpop.permute.xlu1 %97  }
  0x91   :  { %94 = vst.msk [vmem:[#allocation0] sm:$0x1] %vm93_vm15, %v92_v46   ;;  %vm189_vm15 = vcmask 64544  }
  0x92   :  { %100 = vst.msk [vmem:[#allocation0] sm:$0x1] %vm99_vm0, %v98_v47  }
  0x94   :  { %v104_v48 = vpop.permute.xlu0 %103   ;;  %v110_v49 = vpop.permute.xlu1 %109  }
  0x95   :  { %106 = vst.msk [vmem:[#allocation0] sm:$0x1] %vm105_vm1, %v104_v48  }
  0x96   :  { %112 = vst.msk [vmem:[#allocation0] sm:$0x1] %vm111_vm2, %v110_v49  }
  0x98   :  { %v116_v50 = vpop.permute.xlu0 %115   ;;  %v122_v51 = vpop.permute.xlu1 %121  }
  0x99   :  { %118 = vst.msk [vmem:[#allocation0] sm:$0x1] %vm117_vm3, %v116_v50  }
  0x9a   :  { %124 = vst.msk [vmem:[#allocation0] sm:$0x1] %vm123_vm4, %v122_v51  }
  0x9c   :  { %v128_v52 = vpop.permute.xlu0 %127   ;;  %v134_v53 = vpop.permute.xlu1 %133  }
  0x9d   :  { %130 = vst.msk [vmem:[#allocation0] sm:$0x1] %vm129_vm5, %v128_v52  }
  0x9e   :  { %136 = vst.msk [vmem:[#allocation0] sm:$0x1] %vm135_vm6, %v134_v53  }
  0xa0   :  { %v140_v54 = vpop.permute.xlu0 %139   ;;  %v146_v55 = vpop.permute.xlu1 %145  }
  0xa1   :  { %142 = vst.msk [vmem:[#allocation0] sm:$0x1] %vm141_vm7, %v140_v54  }
  0xa2   :  { %148 = vst.msk [vmem:[#allocation0] sm:$0x1] %vm147_vm8, %v146_v55  }
  0xa4   :  { %v152_v56 = vpop.permute.xlu0 %151   ;;  %v158_v57 = vpop.permute.xlu1 %157  }
  0xa5   :  { %154 = vst.msk [vmem:[#allocation0] sm:$0x1] %vm153_vm9, %v152_v56  }
  0xa6   :  { %160 = vst.msk [vmem:[#allocation0] sm:$0x1] %vm159_vm10, %v158_v57  }
  0xa8   :  { %v164_v58 = vpop.permute.xlu0 %163   ;;  %v170_v59 = vpop.permute.xlu1 %169  }
  0xa9   :  { %166 = vst.msk [vmem:[#allocation0] sm:$0x1] %vm165_vm11, %v164_v58  }
  0xaa   :  { %172 = vst.msk [vmem:[#allocation0] sm:$0x1] %vm171_vm12, %v170_v59  }
  0xac   :  { %v176_v60 = vpop.permute.xlu0 %175   ;;  %v182_v61 = vpop.permute.xlu1 %181  }
  0xad   :  { %178 = vst.msk [vmem:[#allocation0] sm:$0x1] %vm177_vm13, %v176_v60  }
  0xae   :  { %184 = vst.msk [vmem:[#allocation0] sm:$0x1] %vm183_vm14, %v182_v61  }
  0xb0   :  { %v188_v62 = vpop.permute.xlu0 %187  }
  0xb1   :  { %190 = vst.msk [vmem:[#allocation0] sm:$0x1] %vm189_vm15, %v188_v62  }
  0xb8   :  { %v194_v63 = vld [vmem:[#allocation0] sm:$0x1] }
  0xb9   :  { %196 = vst [vmem:[%s400_s1] sm:$0x1] %v194_v63 }

// kernel: popart_forward.1
= control target key start
LH: loop header
LB: loop body
LE: loop exit
PB: predicated region body
PF: predicated region fallthrough
CT: control target
= control target key end

     0   :  { %s70_s0 = inlined_call_operand.vmem [shape: f32[8,128], index: 0, kind: input, shape index: {}]   ;;  %s71_s1 = inlined_call_operand.vmem [shape: f32[1,128], index: 1, kind: input, shape index: {}]   ;;  %s72_s2 = inlined_call_operand.vmem [shape: f32[1,128], index: 2, kind: input, shape index: {}]   ;;  %s73_s3 = inlined_call_operand.vmem [shape: f32[8,128], index: 3, kind: output, shape index: {}]  }
   0x1   :  { %v14_v0 = vld [vmem:[%s70_s0] sm:$0xff] }
   0x2   :  { %v36_v1 = vld [vmem:[%s71_s1] ss:$0 sm:$0xff] }
   0x3   :  { %v37_v2 = vld [vmem:[%s72_s2] ss:$0 sm:$0xff]  ;;  %v22_v3 = vmul.f32 %v36_v1, %v14_v0 }
   0x5   :  { %v30_v4 = vadd.f32 %v37_v2, %v22_v3 }
   0x7   :  { %31 = vst [vmem:[%s73_s3] sm:$0xff] %v30_v4 }

</bundles_post_ra>
